<compile_context>
chip_gen: v7x
topology: tpu7x:2x2x1
jax: 0.10.0
libtpu: 0.0.40
codegen_flags: <defaults>
</compile_context>

<pallas_src>
import jax
import jax.numpy as jnp
from jax.experimental import pallas as pl
from jax.experimental.pallas import tpu as pltpu


def _round_up(a, b):
    return ((a + b - 1) // b) * b


def _gating_kernel(x_ref, y_ref, w_rz_ref, b_rz_ref, w_g_ref, b_g_ref, o_ref):
    """One row-tile of the gate.

    x_ref, y_ref : [tm, Dp]        (input dtype)
    w_rz_ref     : [2*Dp, 2*Dp]    bf16, [[Wr^T, Wz^T], [Ur^T, Uz^T]]
    b_rz_ref     : [1, 2*Dp]       f32,  [br+bur | bz+buz-bg]
    w_g_ref      : [2*Dp, Dp]      bf16, [[Wg^T], [Ug^T]]
    b_g_ref      : [1, Dp]         f32,  bwg+bug
    o_ref        : [tm, Dp]
    """
    dp = o_ref.shape[-1]

    x_f32 = x_ref[...].astype(jnp.float32)
    x_bf = x_ref[...].astype(jnp.bfloat16)
    y_bf = y_ref[...].astype(jnp.bfloat16)

    # Fused r/z matmul on the MXU: [tm, 2Dp] @ [2Dp, 2Dp] -> f32 [tm, 2Dp].
    cat_yx = jnp.concatenate([y_bf, x_bf], axis=-1)
    pre_rz = jnp.dot(cat_yx, w_rz_ref[...],
                     preferred_element_type=jnp.float32) + b_rz_ref[...]
    r = jax.nn.sigmoid(pre_rz[:, :dp])
    z = jax.nn.sigmoid(pre_rz[:, dp:])

    # Fused h matmul: [y | r*x] @ [[Wg^T], [Ug^T]] -> f32 [tm, Dp].
    cat_yrx = jnp.concatenate([y_bf, (r * x_f32).astype(jnp.bfloat16)], axis=-1)
    pre_h = jnp.dot(cat_yrx, w_g_ref[...],
                    preferred_element_type=jnp.float32) + b_g_ref[...]
    h = jnp.tanh(pre_h)

    g = (1.0 - z) * x_f32 + z * h
    o_ref[...] = g.astype(o_ref.dtype)


def gating_mechanism(x, y, params, bg=0.1, tile_m=256):
    """x, y: [N, D]. params: dict of 6 (weight, bias) pairs, weights [D, D] (PyTorch layout)."""
    N, D = x.shape
    dp = _round_up(D, 128)                               # lane-dense feature dim
    tm = min(_round_up(tile_m, 8), _round_up(max(N, 1), 8))
    n_pad = _round_up(N, tm)

    f32 = jnp.float32

    def pad_rows(a):
        a = jnp.asarray(a)
        return jnp.pad(a, ((0, n_pad - N), (0, dp - D)))

    xp = pad_rows(x)
    yp = pad_rows(y)

    def wt(name):
        # PyTorch Linear weight is [out, in]; kernel computes v @ W^T.
        w = jnp.asarray(params[name + "_w"], f32).T      # [in, out]
        return jnp.pad(w, ((0, dp - D), (0, dp - D)))

    def bias(name):
        return jnp.asarray(params[name + "_b"], f32)

    # Stacked weights (bf16, built once in plain JAX glue).
    w_rz = jnp.concatenate([
        jnp.concatenate([wt("Wr"), wt("Wz")], axis=1),   # rows 0:dp   act on y
        jnp.concatenate([wt("Ur"), wt("Uz")], axis=1),   # rows dp:2dp act on x
    ], axis=0).astype(jnp.bfloat16)                      # [2dp, 2dp]
    w_g = jnp.concatenate([wt("Wg"), wt("Ug")], axis=0).astype(jnp.bfloat16)  # [2dp, dp]

    def pad_bias(v):
        return jnp.pad(v, (0, dp - D)).reshape(1, dp)

    b_r = pad_bias(bias("Wr") + bias("Ur"))
    b_z = pad_bias(bias("Wz") + bias("Uz") - f32(bg))    # bg folded into bias
    b_rz = jnp.concatenate([b_r, b_z], axis=1)           # [1, 2dp] f32
    b_gate = pad_bias(bias("Wg") + bias("Ug"))           # [1, dp]  f32

    row_spec = pl.BlockSpec((tm, dp), lambda i: (i, 0))
    in_specs = [
        row_spec,                                        # x
        row_spec,                                        # y
        pl.BlockSpec((2 * dp, 2 * dp), lambda i: (0, 0)),  # W_rz (resident)
        pl.BlockSpec((1, 2 * dp), lambda i: (0, 0)),       # b_rz
        pl.BlockSpec((2 * dp, dp), lambda i: (0, 0)),      # W_g  (resident)
        pl.BlockSpec((1, dp), lambda i: (0, 0)),           # b_g
    ]

    # VMEM budget: double-buffered row tiles + resident bf16 weights + temporaries.
    act_bytes = 2 * 3 * tm * dp * 4
    w_bytes = 2 * 6 * dp * dp * 2
    tmp_bytes = 8 * tm * dp * 4
    vmem_limit = int(min(max(2 * (act_bytes + w_bytes + tmp_bytes), 32 << 20), 64 << 20))

    out = pl.pallas_call(
        _gating_kernel,
        out_shape=jax.ShapeDtypeStruct((n_pad, dp), x.dtype),
        grid_spec=pltpu.PrefetchScalarGridSpec(
            num_scalar_prefetch=0,
            grid=(n_pad // tm,),
            in_specs=in_specs,
            out_specs=row_spec,
        ),
        compiler_params=pltpu.CompilerParams(
            dimension_semantics=("parallel",),
            vmem_limit_bytes=vmem_limit,
        ),
    )(xp, yp, w_rz, b_rz, w_g, b_gate)

    return out[:N, :D]


def _init_params(key, d_input):
    """Deterministic init mimicking torch.nn.Linear (uniform +/- 1/sqrt(d))."""
    names = ["Wr", "Ur", "Wz", "Uz", "Wg", "Ug"]
    params = {}
    bound = 1.0 / (d_input ** 0.5)
    keys = jax.random.split(key, 2 * len(names))
    for i, name in enumerate(names):
        params[name + "_w"] = jax.random.uniform(
            keys[2 * i], (d_input, d_input), jnp.float32, -bound, bound)
        params[name + "_b"] = jax.random.uniform(
            keys[2 * i + 1], (d_input,), jnp.float32, -bound, bound)
    return params


def _reference_f32(x, y, params, bg=0.1):
    """Exact PyTorch-semantics (f32) reference."""
    def lin(v, name):
        return v @ params[name + "_w"].T + params[name + "_b"]

    r = jax.nn.sigmoid(lin(y, "Wr") + lin(x, "Ur"))
    z = jax.nn.sigmoid(lin(y, "Wz") + lin(x, "Uz") - bg)
    h = jnp.tanh(lin(y, "Wg") + lin(r * x, "Ug"))
    return (1.0 - z) * x + z * h


def _reference_bf16(x, y, params, bg=0.1):
    """Same math, but matmul operands rounded to bf16 with f32 accumulation,
    matching the kernel's MXU precision (tight-tolerance comparison)."""
    bf = jnp.bfloat16

    def lin(v, name):
        return jnp.dot(v.astype(bf), params[name + "_w"].T.astype(bf),
                       preferred_element_type=jnp.float32) + params[name + "_b"]

    r = jax.nn.sigmoid(lin(y, "Wr") + lin(x, "Ur"))
    z = jax.nn.sigmoid(lin(y, "Wz") + lin(x, "Uz") - bg)
    h = jnp.tanh(lin(y, "Wg") + lin(r * x, "Ug"))
    return (1.0 - z) * x + z * h


if __name__ == "__main__":
    key = jax.random.PRNGKey(0)

    # (N, D, tile_m): small module-consistent case (8 tokens, hidden 32) plus a
    # larger case that exercises the real multi-step tiled path.
    for (N, D, tile_m) in [(8, 32, 256), (512, 128, 256)]:
        k1, k2, k3, key = jax.random.split(key, 4)
        x = jax.random.normal(k1, (N, D), jnp.float32)
        y = jax.random.normal(k2, (N, D), jnp.float32)
        params = _init_params(k3, D)

        out = gating_mechanism(x, y, params, bg=0.1, tile_m=tile_m)
        out = jax.block_until_ready(out)
        assert out.shape == (N, D)

        ref_tight = _reference_bf16(x, y, params, bg=0.1)
        ref_exact = _reference_f32(x, y, params, bg=0.1)
        assert jnp.allclose(out, ref_tight, atol=5e-3, rtol=0.0), \
            f"mismatch vs bf16-matched reference at N={N} D={D}"
        assert jnp.allclose(out, ref_exact, atol=7.5e-2, rtol=0.0), \
            f"mismatch vs f32 reference at N={N} D={D}"

    print("KERNEL_OK")
</pallas_src>

<mosaic_0001>
module attributes {stable_mosaic.version = 11 : i64} {
  func.func @_gating_kernel(%arg0: i32, %arg1: memref<8x128xf32, #tpu.memory_space<vmem>>, %arg2: memref<8x128xf32, #tpu.memory_space<vmem>>, %arg3: memref<256x256xbf16, #tpu.memory_space<vmem>>, %arg4: memref<1x256xf32, #tpu.memory_space<vmem>>, %arg5: memref<256x128xbf16, #tpu.memory_space<vmem>>, %arg6: memref<1x128xf32, #tpu.memory_space<vmem>>, %arg7: memref<8x128xf32, #tpu.memory_space<vmem>>) attributes {dimension_semantics = [#tpu.dimension_semantics<parallel>], iteration_bounds = array<i64: 1>, scalar_prefetch = 0 : i64, scratch_operands = 0 : i64, tpu.core_type = #tpu.core_type<tc>, window_params = [{transform_indices = @transform_0, window_bounds = array<i64: 8, 128>}, {transform_indices = @transform_1, window_bounds = array<i64: 8, 128>}, {pipeline_mode = #tpu.pipeline_mode<synchronous>, transform_indices = @transform_2, window_bounds = array<i64: 256, 256>}, {pipeline_mode = #tpu.pipeline_mode<synchronous>, transform_indices = @transform_3, window_bounds = array<i64: 1, 256>}, {pipeline_mode = #tpu.pipeline_mode<synchronous>, transform_indices = @transform_4, window_bounds = array<i64: 256, 128>}, {pipeline_mode = #tpu.pipeline_mode<synchronous>, transform_indices = @transform_5, window_bounds = array<i64: 1, 128>}, {transform_indices = @transform_6, window_bounds = array<i64: 8, 128>}]} {
    %c0 = arith.constant 0 : index
    %c0_0 = arith.constant 0 : index
    %0 = vector.load %arg1[%c0, %c0_0] : memref<8x128xf32, #tpu.memory_space<vmem>>, vector<8x128xf32>
    %c0_1 = arith.constant 0 : index
    %c0_2 = arith.constant 0 : index
    %1 = vector.load %arg1[%c0_1, %c0_2] : memref<8x128xf32, #tpu.memory_space<vmem>>, vector<8x128xf32>
    %2 = arith.truncf %1 : vector<8x128xf32> to vector<8x128xbf16>
    %c0_3 = arith.constant 0 : index
    %c0_4 = arith.constant 0 : index
    %3 = vector.load %arg2[%c0_3, %c0_4] : memref<8x128xf32, #tpu.memory_space<vmem>>, vector<8x128xf32>
    %4 = arith.truncf %3 : vector<8x128xf32> to vector<8x128xbf16>
    %5 = tpu.concatenate %4, %2 in 1 : vector<8x128xbf16>, vector<8x128xbf16> -> vector<8x256xbf16>
    %c0_5 = arith.constant 0 : index
    %c0_6 = arith.constant 0 : index
    %6 = vector.load %arg3[%c0_5, %c0_6] : memref<256x256xbf16, #tpu.memory_space<vmem>>, vector<256x256xbf16>
    %cst = arith.constant dense<0.000000e+00> : vector<8x256xf32>
    %7 = tpu.matmul %5, %6, %cst {dimension_numbers = #tpu.dot_dimension_numbers<[1], [0], [0], [1], [0, 0, 1, 1], [], []>} : vector<8x256xbf16>, vector<256x256xbf16>, vector<8x256xf32> -> vector<8x256xf32>
    %c0_7 = arith.constant 0 : index
    %c0_8 = arith.constant 0 : index
    %8 = vector.load %arg4[%c0_7, %c0_8] : memref<1x256xf32, #tpu.memory_space<vmem>>, vector<1x256xf32>
    %9 = vector.broadcast %8 : vector<1x256xf32> to vector<8x256xf32>
    %10 = arith.addf %7, %9 : vector<8x256xf32>
    %11 = vector.extract_strided_slice %10 {offsets = [0, 0], sizes = [8, 128], strides = [1, 1]} : vector<8x256xf32> to vector<8x128xf32>
    %12 = arith.negf %11 : vector<8x128xf32>
    %13 = math.exp %12 : vector<8x128xf32>
    %cst_9 = arith.constant 1.000000e+00 : f32
    %14 = vector.broadcast %cst_9 : f32 to vector<8x128xf32>
    %15 = arith.addf %14, %13 : vector<8x128xf32>
    %16 = arith.divf %14, %15 : vector<8x128xf32>
    %17 = vector.extract_strided_slice %10 {offsets = [0, 128], sizes = [8, 128], strides = [1, 1]} : vector<8x256xf32> to vector<8x128xf32>
    %18 = arith.negf %17 : vector<8x128xf32>
    %19 = math.exp %18 : vector<8x128xf32>
    %cst_10 = arith.constant 1.000000e+00 : f32
    %20 = vector.broadcast %cst_10 : f32 to vector<8x128xf32>
    %21 = arith.addf %20, %19 : vector<8x128xf32>
    %22 = arith.divf %20, %21 : vector<8x128xf32>
    %23 = arith.mulf %16, %0 : vector<8x128xf32>
    %24 = arith.truncf %23 : vector<8x128xf32> to vector<8x128xbf16>
    %25 = tpu.concatenate %4, %24 in 1 : vector<8x128xbf16>, vector<8x128xbf16> -> vector<8x256xbf16>
    %c0_11 = arith.constant 0 : index
    %c0_12 = arith.constant 0 : index
    %26 = vector.load %arg5[%c0_11, %c0_12] : memref<256x128xbf16, #tpu.memory_space<vmem>>, vector<256x128xbf16>
    %cst_13 = arith.constant dense<0.000000e+00> : vector<8x128xf32>
    %27 = tpu.matmul %25, %26, %cst_13 {dimension_numbers = #tpu.dot_dimension_numbers<[1], [0], [0], [1], [0, 0, 1, 1], [], []>} : vector<8x256xbf16>, vector<256x128xbf16>, vector<8x128xf32> -> vector<8x128xf32>
    %c0_14 = arith.constant 0 : index
    %c0_15 = arith.constant 0 : index
    %28 = vector.load %arg6[%c0_14, %c0_15] : memref<1x128xf32, #tpu.memory_space<vmem>>, vector<1x128xf32>
    %29 = vector.broadcast %28 : vector<1x128xf32> to vector<8x128xf32>
    %30 = arith.addf %27, %29 : vector<8x128xf32>
    %31 = math.tanh %30 : vector<8x128xf32>
    %cst_16 = arith.constant 1.000000e+00 : f32
    %32 = vector.broadcast %cst_16 : f32 to vector<8x128xf32>
    %33 = arith.subf %32, %22 : vector<8x128xf32>
    %34 = arith.mulf %33, %0 : vector<8x128xf32>
    %35 = arith.mulf %22, %31 : vector<8x128xf32>
    %36 = arith.addf %34, %35 : vector<8x128xf32>
    %c0_17 = arith.constant 0 : index
    %c0_18 = arith.constant 0 : index
    %37 = vector.load %arg7[%c0_17, %c0_18] : memref<8x128xf32, #tpu.memory_space<vmem>>, vector<8x128xf32>
    tpu.vector_store %arg7[%c0_17, %c0_18], %36 {strides = array<i32>} : memref<8x128xf32, #tpu.memory_space<vmem>>, vector<8x128xf32>,
    return
  }
  func.func @transform_0(%arg0: i32) -> (i32, i32) {
    %c0_i32 = arith.constant 0 : i32
    %c0_i32_0 = arith.constant 0 : i32
    return %arg0, %c0_i32 : i32, i32
  }
  func.func @transform_1(%arg0: i32) -> (i32, i32) {
    %c0_i32 = arith.constant 0 : i32
    %c0_i32_0 = arith.constant 0 : i32
    return %arg0, %c0_i32 : i32, i32
  }
  func.func @transform_2(%arg0: i32) -> (i32, i32) {
    %c0_i32 = arith.constant 0 : i32
    %c0_i32_0 = arith.constant 0 : i32
    %c0_i32_1 = arith.constant 0 : i32
    return %c0_i32, %c0_i32_0 : i32, i32
  }
  func.func @transform_3(%arg0: i32) -> (i32, i32) {
    %c0_i32 = arith.constant 0 : i32
    %c0_i32_0 = arith.constant 0 : i32
    %c0_i32_1 = arith.constant 0 : i32
    return %c0_i32, %c0_i32_0 : i32, i32
  }
  func.func @transform_4(%arg0: i32) -> (i32, i32) {
    %c0_i32 = arith.constant 0 : i32
    %c0_i32_0 = arith.constant 0 : i32
    %c0_i32_1 = arith.constant 0 : i32
    return %c0_i32, %c0_i32_0 : i32, i32
  }
  func.func @transform_5(%arg0: i32) -> (i32, i32) {
    %c0_i32 = arith.constant 0 : i32
    %c0_i32_0 = arith.constant 0 : i32
    %c0_i32_1 = arith.constant 0 : i32
    return %c0_i32, %c0_i32_0 : i32, i32
  }
  func.func @transform_6(%arg0: i32) -> (i32, i32) {
    %c0_i32 = arith.constant 0 : i32
    %c0_i32_0 = arith.constant 0 : i32
    return %arg0, %c0_i32 : i32, i32
  }
}

</mosaic_0001>

<bundles_post_ra>
// kernel: tpu_custom_call.1
= control target key start
LH: loop header
LB: loop body
LE: loop exit
PB: predicated region body
PF: predicated region fallthrough
CT: control target
= control target key end

     0   :  { %11 = vsyncpa [#allocation3], 0  ;;  %s927_s0 = inlined_call_operand.hbm [shape: f32[8,128], index: 0, kind: input, shape index: {}]   ;;  %s928_s1 = inlined_call_operand.hbm [shape: f32[8,128], index: 1, kind: input, shape index: {}]   ;;  %s929_s2 = inlined_call_operand.hbm [shape: bf16[256,256], index: 2, kind: input, shape index: {}]   ;;  %s930_s3 = inlined_call_operand.vmem [shape: f32[1,256], index: 3, kind: input, shape index: {}]   ;;  %s931_s4 = inlined_call_operand.hbm [shape: bf16[256,128], index: 4, kind: input, shape index: {}]   ;;  %s932_s5 = inlined_call_operand.vmem [shape: f32[1,128], index: 5, kind: input, shape index: {}]   ;;  %s933_s6 = inlined_call_operand.hbm [shape: f32[8,128], index: 6, kind: output, shape index: {}]  }
   0x1   :  { %12 = vsyncpa [#allocation6], 0 }
   0x2   :  { %13 = vsyncpa [#allocation9], 0 }
   0x3   :  { %14 = vsyncpa [#allocation4], 0  ;;  %s811_s21 = smov [#allocation5]   ;;  %s812_s23 = smov [#allocation2]  }
   0x4   :  { %s31_s22 = sshll.u32 %s811_s21, 4  ;;  %s21_s24 = sshll.u32 %s812_s23, 4  ;;  %s32_s22 = int_to_ptr.vmem [resolvable:$true] %s31_s22  ;;  %s22_s24 = int_to_ptr.vmem [resolvable:$true] %s21_s24 }
   0x5   :  { %s693_s27 = scalar_lea.hbm %s928_s1, 128 }
   0x6   :  { %p694_p0 = scmp.ne.s32.totalorder %s928_s1, %s693_s27  ;;  %p697_p1 = scmp.lt.u32.totalorder %s693_s27, %s928_s1 }
   0x8   :  { %p699_p2 = pnand %p697_p1, %p694_p0 }
   0xa   :  { %702 = shalt.err (!%p699_p2)
}
   0xb   :  { %s703_s8 = scalar_lea.vmem %s32_s22, 128  ;;  %p708_p4 = scmp.lt.s32.totalorder %s32_s22, %s32_s22 }
   0xc   :  { %p704_p3 = scmp.ne.s32.totalorder %s32_s22, %s703_s8  ;;  %p709_p5 = scmp.lt.s32.totalorder %s703_s8, %s703_s8 }
   0xe   :  { %p710_p6 = por %p709_p5, %p708_p4 }
  0x10   :  { %p711_p7 = pnand %p710_p6, %p704_p3 }
  0x12   :  { %714 = shalt.err (!%p711_p7)
}
  0x13   :  { %34 = dma.hbm_to_vmem [thread:$0]  %s928_s1, 128, %s32_s22, [#allocation6]  }
  0x14   :  { %s715_s13 = scalar_lea.hbm %s927_s0, 128 }
  0x15   :  { %p716_p8 = scmp.ne.s32.totalorder %s927_s0, %s715_s13  ;;  %p719_p9 = scmp.lt.u32.totalorder %s715_s13, %s927_s0 }
  0x17   :  { %p721_p10 = pnand %p719_p9, %p716_p8 }
  0x19   :  { %724 = shalt.err (!%p721_p10)
}
  0x1a   :  { %s725_s18 = scalar_lea.vmem %s22_s24, 128  ;;  %p730_p12 = scmp.lt.s32.totalorder %s22_s24, %s22_s24 }
  0x1b   :  { %p726_p11 = scmp.ne.s32.totalorder %s22_s24, %s725_s18  ;;  %p731_p13 = scmp.lt.s32.totalorder %s725_s18, %s725_s18 }
  0x1d   :  { %p732_p0 = por %p731_p13, %p730_p12 }
  0x1f   :  { %p733_p1 = pnand %p732_p0, %p726_p11 }
  0x21   :  { %736 = shalt.err (!%p733_p1)
}
  0x22   :  { %24 = dma.hbm_to_vmem [thread:$0]  %s927_s0, 128, %s22_s24, [#allocation3]  }
  0x23   :  { %s813_s20 = smov [#allocation7]   ;;  %s737_s25 = scalar_lea.hbm %s929_s2, 4096 }
  0x24   :  { %s40_s21 = sshll.u32 %s813_s20, 4  ;;  %p738_p2 = scmp.ne.s32.totalorder %s929_s2, %s737_s25  ;;  %s41_s21 = int_to_ptr.vmem [resolvable:$true] %s40_s21 }
  0x25   :  { %p741_p3 = scmp.lt.u32.totalorder %s737_s25, %s929_s2 }
  0x27   :  { %p743_p4 = pnand %p741_p3, %p738_p2 }
  0x29   :  { %746 = shalt.err (!%p743_p4)
}
  0x2a   :  { %s747_s30 = scalar_lea.vmem %s41_s21, 4096  ;;  %p752_p6 = scmp.lt.s32.totalorder %s41_s21, %s41_s21 }
  0x2b   :  { %p748_p5 = scmp.ne.s32.totalorder %s41_s21, %s747_s30  ;;  %p753_p7 = scmp.lt.s32.totalorder %s747_s30, %s747_s30 }
  0x2d   :  { %p754_p8 = por %p753_p7, %p752_p6 }
  0x2f   :  { %p755_p9 = pnand %p754_p8, %p748_p5 }
  0x31   :  { %758 = shalt.err (!%p755_p9)
}
  0x32   :  { %s814_s0 = smov 128   ;;  %s815_s24 = smov 8  }
  0x33   :  { %46 = dma.hbm_to_vmem [thread:$0]  %s929_s2, 4096, %s41_s21, [#allocation6], %s814_s0, %s814_s0, %s815_s24  }
  0x34   :  { %s816_s9 = smov [#allocation8]   ;;  %s759_s13 = scalar_lea.hbm %s931_s4, 2048 }
  0x35   :  { %s54_s10 = sshll.u32 %s816_s9, 4  ;;  %p760_p10 = scmp.ne.s32.totalorder %s931_s4, %s759_s13  ;;  %s55_s10 = int_to_ptr.vmem [resolvable:$true] %s54_s10 }
  0x36   :  { %p763_p11 = scmp.lt.u32.totalorder %s759_s13, %s931_s4 }
  0x38   :  { %p765_p12 = pnand %p763_p11, %p760_p10 }
  0x3a   :  { %768 = shalt.err (!%p765_p12)
}
  0x3b   :  { %s769_s18 = scalar_lea.vmem %s55_s10, 2048  ;;  %p774_p0 = scmp.lt.s32.totalorder %s55_s10, %s55_s10 }
  0x3c   :  { %p770_p13 = scmp.ne.s32.totalorder %s55_s10, %s769_s18  ;;  %p775_p1 = scmp.lt.s32.totalorder %s769_s18, %s769_s18 }
  0x3e   :  { %p776_p2 = por %p775_p1, %p774_p0 }
  0x40   :  { %p777_p3 = pnand %p776_p2, %p770_p13 }
  0x42   :  { %780 = shalt.err (!%p777_p3)
}
  0x43   :  { %s817_s2 = smov 64   ;;  %s818_s1 = smov 4  }
  0x44   :  { %60 = dma.hbm_to_vmem [thread:$0]  %s931_s4, 2048, %s55_s10, [#allocation9], %s817_s2, %s817_s2, %s818_s1  }
  0x45   :  { %803 = dma.done.wait [#allocation3], 128  }
  0x46   :  { %804 = vsyncadd [#allocation3], 4294967168 }
  0x47   :  { %805 = dma.done.wait [#allocation6], 4224  }
  0x48   :  { %806 = vsyncadd [#allocation6], 4294963072 }
  0x49   :  { %807 = dma.done.wait [#allocation9], 2048  }
  0x4a   :  { %808 = vsyncadd [#allocation9], 4294965248  ;;  %v619_v0 = vld [vmem:[#allocation7 + $0x4] ss:$8 sps:$4 sm:$0xff]   ;;  %v621_v1 = vld [vmem:[#allocation7] ss:$8 sps:$4 sm:$0xff]   ;;  %v114_v52 = vlaneseq }
  0x4b   :  { %284 = vmatprep.subr.bf16.mxu0 %v619_v0  ;;  %v622_v2 = vld [vmem:[#allocation7 + $0x14] ss:$8 sps:$4 sm:$0xff]   ;;  %v624_v3 = vld [vmem:[#allocation7 + $0x10] ss:$8 sps:$4 sm:$0xff]   ;;  %v625_v4 = vld [vmem:[#allocation7 + $0x24] ss:$8 sps:$4 sm:$0xff]  }
  0x4c   :  { %285 = vmatpush1.bf16.msra.mxu0 %v621_v1  ;;  %v627_v5 = vld [vmem:[#allocation7 + $0x20] ss:$8 sps:$4 sm:$0xff]   ;;  %v628_v6 = vld [vmem:[#allocation7 + $0x34] ss:$8 sps:$4 sm:$0xff]   ;;  %v630_v7 = vld [vmem:[#allocation7 + $0x30] ss:$8 sps:$4 sm:$0xff]  }
  0x4d   :  { %286 = vmatprep.subr.bf16.mxu0 %v622_v2  ;;  %v631_v8 = vld [vmem:[#allocation7 + $0x44] ss:$8 sps:$4 sm:$0xff]   ;;  %v633_v9 = vld [vmem:[#allocation7 + $0x40] ss:$8 sps:$4 sm:$0xff]   ;;  %v634_v10 = vld [vmem:[#allocation7 + $0x54] ss:$8 sps:$4 sm:$0xff]  }
  0x4e   :  { %v636_v11 = vld [vmem:[#allocation7 + $0x50] ss:$8 sps:$4 sm:$0xff]   ;;  %v637_v12 = vld [vmem:[#allocation7 + $0x64] ss:$8 sps:$4 sm:$0xff]   ;;  %v639_v13 = vld [vmem:[#allocation7 + $0x60] ss:$8 sps:$4 sm:$0xff]  }
  0x4f   :  { %v903_v14 = vld [vmem:[#allocation2] sm:$0xff]  ;;  %v643_v18 = vld [vmem:[#allocation7 + $0x84] ss:$8 sps:$4 sm:$0xff]   ;;  %v645_v19 = vld [vmem:[#allocation7 + $0x80] ss:$8 sps:$4 sm:$0xff]   ;;  %v115_v53 = vshrl.u32 %v114_v52, 7 }
  0x50   :  { %287 = vmatpush1.bf16.msra.mxu0 %v624_v3  ;;  %v640_v15 = vld [vmem:[#allocation7 + $0x74] ss:$8 sps:$4 sm:$0xff]   ;;  %v77_v16 = vpack.c.bf16 %v903_v14, %v903_v14  ;;  %v642_v17 = vld [vmem:[#allocation7 + $0x70] ss:$8 sps:$4 sm:$0xff]   ;;  %v649_v22 = vld [vmem:[#allocation7 + $0xa4] ss:$8 sps:$4 sm:$0xff]  }
  0x51   :  { %288 = vmatprep.subr.bf16.mxu0 %v625_v4  ;;  %v646_v20 = vld [vmem:[#allocation7 + $0x94] ss:$8 sps:$4 sm:$0xff]   ;;  %v648_v21 = vld [vmem:[#allocation7 + $0x90] ss:$8 sps:$4 sm:$0xff]   ;;  %v651_v23 = vld [vmem:[#allocation7 + $0xa0] ss:$8 sps:$4 sm:$0xff]  }
  0x52   :  { %316 = vmatprep.mubr.bf16.mxu0 %v77_v16  ;;  %v652_v24 = vld [vmem:[#allocation7 + $0xb4] ss:$8 sps:$4 sm:$0xff]   ;;  %v654_v25 = vld [vmem:[#allocation7 + $0xb0] ss:$8 sps:$4 sm:$0xff]   ;;  %v655_v26 = vld [vmem:[#allocation7 + $0xc4] ss:$8 sps:$4 sm:$0xff]  }
  0x53   :  { %v657_v27 = vld [vmem:[#allocation7 + $0xc0] ss:$8 sps:$4 sm:$0xff]   ;;  %v658_v28 = vld [vmem:[#allocation7 + $0xd4] ss:$8 sps:$4 sm:$0xff]   ;;  %v660_v29 = vld [vmem:[#allocation7 + $0xd0] ss:$8 sps:$4 sm:$0xff]  }
  0x54   :  { %289 = vmatpush1.bf16.msra.mxu0 %v627_v5  ;;  %v661_v30 = vld [vmem:[#allocation7 + $0xe4] ss:$8 sps:$4 sm:$0xff]   ;;  %v663_v31 = vld [vmem:[#allocation7 + $0xe0] ss:$8 sps:$4 sm:$0xff]   ;;  %v664_v32 = vld [vmem:[#allocation7 + $0xf4] ss:$8 sps:$4 sm:$0xff]  }
  0x55   :  { %290 = vmatprep.subr.bf16.mxu0 %v628_v6  ;;  %v666_v33 = vld [vmem:[#allocation7 + $0xf0] ss:$8 sps:$4 sm:$0xff]   ;;  %v667_v36 = vld [vmem:[#allocation8 + $0x40] sm:$0xff]   ;;  %v669_v38 = vld [vmem:[#allocation8 + $0x48] sm:$0xff]   ;;  %v116_v54 = vsub.s32 0, %v115_v53  ;;  %v120_v4 = vsub.s32 1, %v115_v53 }
  0x56   :  { %v78_v34 = vld [vmem:[#allocation5] sm:$0xff]  ;;  %v668_v37 = vld [vmem:[#allocation8] sm:$0xff]   ;;  %588 = vmatprep.subr.bf16.mxu1 %v667_v36  ;;  %v670_v39 = vld [vmem:[#allocation8 + $0x8] sm:$0xff]   ;;  %s819_s23 = smov [#allocation10]  }
  0x57   :  { %v79_v35 = vpack.c.bf16 %v78_v34, %v78_v34  ;;  %589 = vmatpush3.bf16.msra.mxu1 %v668_v37  ;;  %v671_v40 = vld [vmem:[#allocation8 + $0x50] sm:$0xff]   ;;  %v673_v42 = vld [vmem:[#allocation8 + $0x58] sm:$0xff]   ;;  %v675_v44 = vld [vmem:[#allocation8 + $0x60] sm:$0xff]   ;;  %s526_s25 = sshll.u32 %s819_s23, 4  ;;  %s527_s25 = int_to_ptr.vmem [resolvable:$true] %s526_s25 }
  0x58   :  { %291 = vmatpush1.bf16.msra.mxu0 %v630_v7  ;;  %590 = vmatprep.subr.bf16.mxu1 %v669_v38  ;;  %v672_v41 = vld [vmem:[#allocation8 + $0x10] sm:$0xff]   ;;  %v674_v43 = vld [vmem:[#allocation8 + $0x18] sm:$0xff]   ;;  %v676_v45 = vld [vmem:[#allocation8 + $0x20] sm:$0xff]   ;;  %s781_s26 = scalar_lea.vmem %s527_s25, 128  ;;  %p786_p5 = scmp.lt.s32.totalorder %s527_s25, %s527_s25 }
  0x59   :  { %292 = vmatprep.subr.bf16.mxu0 %v631_v8  ;;  %v677_v46 = vld [vmem:[#allocation8 + $0x68] sm:$0xff]   ;;  %v679_v48 = vld [vmem:[#allocation8 + $0x70] sm:$0xff]   ;;  %v681_v50 = vld [vmem:[#allocation8 + $0x78] sm:$0xff]   ;;  %p782_p4 = scmp.ne.s32.totalorder %s527_s25, %s781_s26  ;;  %p787_p6 = scmp.lt.s32.totalorder %s781_s26, %s781_s26 }
  0x5a   :  { %v678_v47 = vld [vmem:[#allocation8 + $0x28] sm:$0xff]   ;;  %v680_v49 = vld [vmem:[#allocation8 + $0x30] sm:$0xff]   ;;  %v682_v51 = vld [vmem:[#allocation8 + $0x38] sm:$0xff]  }
  0x5b   :  { %591 = vmatpush3.bf16.msra.mxu1 %v670_v39  ;;  %v112_v55 = vld [vmem:[%s930_s3] sm:$0x3]  ;;  %p788_p7 = por %p787_p6, %p786_p5 }
  0x5c   :  { %293 = vmatpush1.bf16.msra.mxu0 %v633_v9  ;;  %592 = vmatprep.subr.bf16.mxu1 %v671_v40  ;;  %v117_v56 = vrot.slane %v112_v55, %v116_v54  ;;  %v121_v5 = vrot.slane %v112_v55, %v120_v4 }
  0x5d   :  { %294 = vmatprep.subr.bf16.mxu0 %v634_v10  ;;  %p789_p8 = pnand %p788_p7, %p782_p4 }
  0x5f   :  { %593 = vmatpush3.bf16.msra.mxu1 %v672_v41 }
  0x60   :  { %295 = vmatpush1.bf16.msra.mxu0 %v636_v11  ;;  %594 = vmatprep.subr.bf16.mxu1 %v673_v42  ;;  %v571_v11 = vld [vmem:[%s932_s5] ss:$0 sm:$0xff] }
  0x61   :  { %296 = vmatprep.subr.bf16.mxu0 %v637_v12 }
  0x63   :  { %595 = vmatpush3.bf16.msra.mxu1 %v674_v43 }
  0x64   :  { %297 = vmatpush1.bf16.msra.mxu0 %v639_v13  ;;  %596 = vmatprep.subr.bf16.mxu1 %v675_v44 }
  0x65   :  { %298 = vmatprep.subr.bf16.mxu0 %v640_v15 }
  0x67   :  { %597 = vmatpush3.bf16.msra.mxu1 %v676_v45 }
  0x68   :  { %299 = vmatpush1.bf16.msra.mxu0 %v642_v17  ;;  %598 = vmatprep.subr.bf16.mxu1 %v677_v46 }
  0x69   :  { %300 = vmatprep.subr.bf16.mxu0 %v643_v18 }
  0x6b   :  { %599 = vmatpush3.bf16.msra.mxu1 %v678_v47 }
  0x6c   :  { %301 = vmatpush1.bf16.msra.mxu0 %v645_v19  ;;  %600 = vmatprep.subr.bf16.mxu1 %v679_v48 }
  0x6d   :  { %302 = vmatprep.subr.bf16.mxu0 %v646_v20 }
  0x6f   :  { %601 = vmatpush3.bf16.msra.mxu1 %v680_v49 }
  0x70   :  { %303 = vmatpush1.bf16.msra.mxu0 %v648_v21  ;;  %602 = vmatprep.subr.bf16.mxu1 %v681_v50 }
  0x71   :  { %304 = vmatprep.subr.bf16.mxu0 %v649_v22 }
  0x73   :  { %603 = vmatpush3.bf16.msra.mxu1 %v682_v51 }
  0x74   :  { %305 = vmatpush1.bf16.msra.mxu0 %v651_v23 }
  0x75   :  { %306 = vmatprep.subr.bf16.mxu0 %v652_v24 }
  0x78   :  { %307 = vmatpush1.bf16.msra.mxu0 %v654_v25 }
  0x79   :  { %308 = vmatprep.subr.bf16.mxu0 %v655_v26 }
  0x7c   :  { %309 = vmatpush1.bf16.msra.mxu0 %v657_v27 }
  0x7d   :  { %310 = vmatprep.subr.bf16.mxu0 %v658_v28 }
  0x80   :  { %311 = vmatpush1.bf16.msra.mxu0 %v660_v29 }
  0x81   :  { %312 = vmatprep.subr.bf16.mxu0 %v661_v30 }
  0x84   :  { %313 = vmatpush1.bf16.msra.mxu0 %v663_v31 }
  0x85   :  { %314 = vmatprep.subr.bf16.mxu0 %v664_v32 }
  0x88   :  { %315 = vmatpush1.bf16.msra.mxu0 %v666_v33 }
  0x8b   :  { %317 = vmatmul.mubr.bf16.vlgmr.msra.gmra.mrb[0].mxu0 %v79_v35 }
 0x15e   :  { %v318_v57 = vpop.f32.mrb[0].mxu0 }
 0x15f   :  { %v319_v58 = vadd.f32 %v318_v57, %v117_v56  ;;  %v320_v59 = vpop.f32.mrb[1].mxu0 }
 0x160   :  { %v322_v60 = vpop.f32.mrb[2].mxu0  ;;  %v321_v6 = vadd.f32 %v320_v59, %v121_v5 }
 0x161   :  { %v569_v61 = vmul.f32 -1.442695, %v319_v58  ;;  %v323_v62 = vpop.f32.mrb[3].mxu0 }
 0x162   :  { %v570_v7 = vmul.f32 -1.442695, %v321_v6 }
 0x163   :  { %683 = vpow2.f32 %v569_v61 }
 0x16d   :  { %v684_v63 = vpop.eup %683 }
 0x16e   :  { %v328_v0 = vadd.f32 1.0, %v684_v63 }
 0x170   :  { %685 = vrcp.f32 %v328_v0 }
 0x171   :  { %687 = vpow2.f32 %v570_v7 }
 0x17a   :  { %v686_v1 = vpop.eup %685 }
 0x17b   :  { %v337_v2 = vmul.f32 %v686_v1, %v903_v14  ;;  %v688_v8 = vpop.eup %687 }
 0x17c   :  { %v334_v9 = vadd.f32 1.0, %v688_v8 }
 0x17d   :  { %v338_v3 = vpack.c.bf16 %v337_v2, %v337_v2 }
 0x17e   :  { %689 = vrcp.f32 %v334_v9 }
 0x17f   :  { %506 = vmatprep.mubr.bf16.mxu1 %v338_v3 }
 0x180   :  { %507 = vmatmul.mubr.bf16.vlgmr.msra.gmra.mrb[0].mxu1 %v79_v35 }
 0x188   :  { %v690_v18 = vpop.eup %689 }
 0x189   :  { %v515_v19 = vsub.f32 1.0, %v690_v18 }
 0x18b   :  { %v516_v21 = vmul.f32 %v515_v19, %v903_v14 }
 0x253   :  { %v604_v10 = vpop.f32.mrb[0].mxu1 }
 0x254   :  { %v605_v12 = vpop.f32.mrb[1].mxu1 }
 0x255   :  { %v606_v13 = vadd.f32 %v605_v12, %v604_v10  ;;  %v607_v15 = vpop.f32.mrb[2].mxu1 }
 0x256   :  { %v608_v16 = vpop.f32.mrb[3].mxu1 }
 0x257   :  { %v509_v17 = vadd.f32 %v606_v13, %v571_v11 }
 0x259   :  { %691 = vtanh.f32 %v509_v17 }
 0x263   :  { %v692_v20 = vpop.eup %691 }
 0x264   :  { %v517_v22 = vmul.f32 %v692_v20, %v690_v18 }
 0x266   :  { %v518_v23 = vadd.f32 %v517_v22, %v516_v21 }
 0x268   :  { %519 = vst [vmem:[#allocation10] sm:$0xff] %v518_v23 }
 0x269   :  { %792 = shalt.err (!%p789_p8)
}
 0x26a   :  { %s793_s28 = scalar_lea.hbm %s933_s6, 128 }
 0x26b   :  { %p794_p9 = scmp.ne.s32.totalorder %s933_s6, %s793_s28  ;;  %p797_p10 = scmp.lt.u32.totalorder %s793_s28, %s933_s6 }
 0x26d   :  { %p799_p11 = pnand %p797_p10, %p794_p9 }
 0x26f   :  { %802 = shalt.err (!%p799_p11)
}
 0x270   :  { %529 = dma.vmem_to_hbm [thread:$0]  %s527_s25, 128, %s933_s6, [#allocation4]  }
 0x271   :  { %809 = dma.done.wait [#allocation4], 128  }
 0x272   :  { %810 = vsyncadd [#allocation4], 4294967168 }
 0x273   :  { %533 = vsyncpa [#allocation3], 1 }
 0x274   :  { %534 = vsyncpa [#allocation6], 1 }
 0x275   :  { %535 = vsyncpa [#allocation9], 1 }
 0x276   :  { %536 = vsyncpa [#allocation4], 1 }

</bundles_post_ra>
